<compile_context>
chip_gen: v7x
topology: tpu7x:2x2x1
jax: 0.10.0
libtpu: 0.0.40
codegen_flags: <defaults>
</compile_context>

<pallas_src>
import functools
import math

import jax
import jax.numpy as jnp
from jax.experimental import pallas as pl
from jax.experimental.pallas import tpu as pltpu


def _round_up(a, b):
    return -(-a // b) * b


# ------------------------------- kernel -------------------------------------


def _agg_kernel(adj_ref, rhs_ref, invdeg_ref, root_ref, o_ref, acc_ref, *, apply_relu):
    """o[tile] = [relu]( invdeg[tile] * sum_k A[tile, k] @ RHS[k] + root[tile] )."""
    k = pl.program_id(1)

    @pl.when(k == 0)
    def _():
        acc_ref[...] = jnp.zeros_like(acc_ref)

    # int8 edge counts -> bf16 upcast is free VPU filler in a mem-bound loop;
    # the dot accumulates in f32 on the MXU.
    acc_ref[...] += jnp.dot(adj_ref[...].astype(jnp.bfloat16), rhs_ref[...],
                            preferred_element_type=jnp.float32)

    @pl.when(k == pl.num_programs(1) - 1)
    def _():
        out = acc_ref[...] * invdeg_ref[...] + root_ref[...]
        if apply_relu:
            out = jnp.maximum(out, 0.0)
        o_ref[...] = out.astype(o_ref.dtype)


def _spmm_pass(adj, inv_deg, rhs, root, *, tile_n, tile_k, apply_relu, out_dtype):
    """One SAGE aggregation pass over the dense int8 adjacency."""
    n_pad = adj.shape[0]
    f = rhs.shape[1]                       # lane-dense (multiple of 128)
    grid = (n_pad // tile_n, n_pad // tile_k)

    out_bytes = jnp.dtype(out_dtype).itemsize
    cost = pl.CostEstimate(
        flops=2 * n_pad * n_pad * f,
        transcendentals=0,
        bytes_accessed=(n_pad * n_pad                      # int8 A
                        + 2 * n_pad * f                    # bf16 RHS
                        + 4 * n_pad * f                    # f32 root
                        + 4 * n_pad                        # 1/deg
                        + out_bytes * n_pad * f))

    return pl.pallas_call(
        functools.partial(_agg_kernel, apply_relu=apply_relu),
        out_shape=jax.ShapeDtypeStruct((n_pad, f), out_dtype),
        grid=grid,
        in_specs=[
            pl.BlockSpec((tile_n, tile_k), lambda i, k: (i, k)),   # A counts (int8)
            pl.BlockSpec((tile_k, f),      lambda i, k: (k, 0)),   # RHS (bf16, lane-dense)
            pl.BlockSpec((tile_n, 1),      lambda i, k: (i, 0)),   # 1/deg (f32)
            pl.BlockSpec((tile_n, f),      lambda i, k: (i, 0)),   # root term (f32)
        ],
        out_specs=pl.BlockSpec((tile_n, f), lambda i, k: (i, 0)),
        scratch_shapes=[pltpu.VMEM((tile_n, f), jnp.float32)],     # K accumulator
        compiler_params=pltpu.CompilerParams(
            dimension_semantics=("parallel", "arbitrary"),
            vmem_limit_bytes=32 * 1024 * 1024),
        cost_estimate=cost,
    )(adj, rhs, inv_deg, root)


# ------------------------------- wrapper ------------------------------------


def variational_gcn_encoder(x, edge_index, params, *, tile_n=256, tile_k=1024):
    """x: [N, in_ch] float32.  edge_index: [2, E] int32 (row 0 = src, row 1 = dst).

    tile_n should be a multiple of 32 (int8 sublane tiling), tile_k a multiple of 128.
    """
    n, _ = x.shape
    hid = params["w1_l"].shape[1]        # 2 * out_channels
    out_ch = params["wmu_l"].shape[1]    # out_channels
    oc2 = 2 * out_ch

    n128 = _round_up(n, 128)
    tile_n = max(32, min(tile_n, n128))
    tile_k = max(128, min(tile_k, n128))
    n_pad = _round_up(n, math.lcm(tile_n, tile_k))

    hid_pad = _round_up(hid, 128)
    oc2_pad = _round_up(oc2, 128)

    # ---- glue: int8 dense adjacency counts + inverse in-degree (O(E) build) ----
    # TODO(synk): a truly sparse (CSR / segment) aggregation has no clean BlockSpec
    # equivalent, so the edge list is densified into int8 counts (exact up to 127
    # parallel edges per node pair).
    src, dst = edge_index[0], edge_index[1]
    adj = (jnp.zeros((n_pad, n_pad), jnp.int32).at[dst, src].add(1)).astype(jnp.int8)
    deg = jnp.zeros((n_pad,), jnp.float32).at[dst].add(1.0)
    inv_deg = (1.0 / jnp.maximum(deg, 1.0)).reshape(n_pad, 1)
    x_pad = jnp.pad(x, ((0, n_pad - n), (0, 0)))

    # ---- pass 1: SAGEConv(in_ch -> hid) + ReLU ----
    # Hoisted feature matmuls: A @ (x @ W1_l) == (A @ x) @ W1_l, and the 1/deg scaling
    # commutes with right multiplication. Padded weight columns are zero so padded
    # output lanes are exactly zero after ReLU.
    w1l = jnp.pad(params["w1_l"], ((0, 0), (0, hid_pad - hid)))
    w1r = jnp.pad(params["w1_r"], ((0, 0), (0, hid_pad - hid)))
    b1 = jnp.pad(params["b1"], ((0, 0), (0, hid_pad - hid)))
    rhs1 = (x_pad @ w1l).astype(jnp.bfloat16)          # [n_pad, hid_pad] bf16, lane-dense
    root1 = x_pad @ w1r + b1                           # [n_pad, hid_pad] f32

    h = _spmm_pass(adj, inv_deg, rhs1, root1, tile_n=tile_n, tile_k=tile_k,
                   apply_relu=True, out_dtype=jnp.bfloat16)

    # ---- pass 2: fused mu | logstd heads (one lane-dense output slab) ----
    wl = jnp.pad(jnp.concatenate([params["wmu_l"], params["wls_l"]], axis=1),
                 ((0, hid_pad - hid), (0, oc2_pad - oc2)))
    wr = jnp.pad(jnp.concatenate([params["wmu_r"], params["wls_r"]], axis=1),
                 ((0, hid_pad - hid), (0, oc2_pad - oc2)))
    bh = jnp.pad(jnp.concatenate([params["bmu"], params["bls"]], axis=1),
                 ((0, 0), (0, oc2_pad - oc2)))
    h32 = h.astype(jnp.float32)
    rhs2 = (h32 @ wl).astype(jnp.bfloat16)             # [n_pad, oc2_pad] bf16, lane-dense
    root2 = h32 @ wr + bh                              # [n_pad, oc2_pad] f32

    out = _spmm_pass(adj, inv_deg, rhs2, root2, tile_n=tile_n, tile_k=tile_k,
                     apply_relu=False, out_dtype=jnp.float32)

    return out[:n, :out_ch], out[:n, out_ch:oc2]


# ------------------------------- params / ref --------------------------------


def init_params(key, in_channels, out_channels):
    hid = 2 * out_channels
    keys = jax.random.split(key, 6)

    def glorot(k, fan_in, fan_out):
        scale = jnp.sqrt(6.0 / (fan_in + fan_out))
        # stored as (in, out) so the kernel / wrapper needs no transpose
        return jax.random.uniform(k, (fan_in, fan_out), jnp.float32, -scale, scale)

    return {
        # conv1: SAGEConv(in_channels, 2*out_channels)
        "w1_l": glorot(keys[0], in_channels, hid),
        "w1_r": glorot(keys[1], in_channels, hid),
        "b1":   jnp.zeros((1, hid), jnp.float32),
        # conv_mu: SAGEConv(2*out_channels, out_channels)
        "wmu_l": glorot(keys[2], hid, out_channels),
        "wmu_r": glorot(keys[3], hid, out_channels),
        "bmu":   jnp.zeros((1, out_channels), jnp.float32),
        # conv_logstd: SAGEConv(2*out_channels, out_channels)
        "wls_l": glorot(keys[4], hid, out_channels),
        "wls_r": glorot(keys[5], hid, out_channels),
        "bls":   jnp.zeros((1, out_channels), jnp.float32),
    }


def _reference(x, edge_index, params):
    """Pure-JAX f32 reference (matches the PyTorch module's semantics)."""
    n = x.shape[0]
    src, dst = edge_index[0], edge_index[1]
    adj = jnp.zeros((n, n), jnp.float32).at[dst, src].add(1.0)
    a_norm = adj / jnp.maximum(jnp.sum(adj, axis=1, keepdims=True), 1.0)

    def sage(xin, wl, wr, b):
        return (a_norm @ xin) @ wl + xin @ wr + b

    h = jax.nn.relu(sage(x, params["w1_l"], params["w1_r"], params["b1"]))
    mu = sage(h, params["wmu_l"], params["wmu_r"], params["bmu"])
    ls = sage(h, params["wls_l"], params["wls_r"], params["bls"])
    return mu, ls


# --------------------------------- demo --------------------------------------


if __name__ == "__main__":
    key = jax.random.PRNGKey(0)
    k_x, k_e, k_p = jax.random.split(key, 3)

    num_nodes = 256        # 2 row tiles x 2 K tiles -> exercises the accumulator grid
    in_channels = 16
    out_channels = 32
    num_edges = 1024

    x = jax.random.normal(k_x, (num_nodes, in_channels), jnp.float32)
    edge_index = jax.random.randint(k_e, (2, num_edges), 0, num_nodes, jnp.int32)
    params = init_params(k_p, in_channels, out_channels)

    mu, logstd = variational_gcn_encoder(x, edge_index, params, tile_n=128, tile_k=128)
    jax.block_until_ready((mu, logstd))

    mu_ref, ls_ref = _reference(x, edge_index, params)
    assert mu.shape == (num_nodes, out_channels)
    assert logstd.shape == (num_nodes, out_channels)
    # bf16 RHS / h operands (f32 accumulation, exact int8 A) -> loosened tolerance.
    assert jnp.allclose(mu, mu_ref, atol=3e-2, rtol=3e-2)
    assert jnp.allclose(logstd, ls_ref, atol=3e-2, rtol=3e-2)

    print("KERNEL_OK")
</pallas_src>

<mosaic_0001>
module attributes {stable_mosaic.version = 11 : i64} {
  func.func @_agg_kernel(%arg0: i32, %arg1: i32, %arg2: memref<128x128xi8, #tpu.memory_space<vmem>>, %arg3: memref<128x128xbf16, #tpu.memory_space<vmem>>, %arg4: memref<128x1xf32, #tpu.memory_space<vmem>>, %arg5: memref<128x128xf32, #tpu.memory_space<vmem>>, %arg6: memref<128x128xbf16, #tpu.memory_space<vmem>>, %arg7: memref<128x128xf32, #tpu.memory_space<vmem>>) attributes {dimension_semantics = [#tpu.dimension_semantics<parallel>, #tpu.dimension_semantics<arbitrary>], iteration_bounds = array<i64: 2, 2>, scalar_prefetch = 0 : i64, scratch_operands = 1 : i64, tpu.core_type = #tpu.core_type<tc>, window_params = [{transform_indices = @transform_0, window_bounds = array<i64: 128, 128>}, {transform_indices = @transform_1, window_bounds = array<i64: 128, 128>}, {transform_indices = @transform_2, window_bounds = array<i64: 128, 1>}, {transform_indices = @transform_3, window_bounds = array<i64: 128, 128>}, {transform_indices = @transform_4, window_bounds = array<i64: 128, 128>}]} {
    %c0_i32 = arith.constant 0 : i32
    %0 = arith.cmpi eq, %arg1, %c0_i32 : i32
    %1 = arith.extui %0 : i1 to i32
    %c0_i32_0 = arith.constant 0 : i32
    %2 = arith.cmpi ne, %1, %c0_i32_0 : i32
    scf.if %2 {
      %cst_9 = arith.constant 0.000000e+00 : f32
      %13 = vector.broadcast %cst_9 : f32 to vector<128x128xf32>
      %c0_10 = arith.constant 0 : index
      %c0_11 = arith.constant 0 : index
      %14 = vector.load %arg7[%c0_10, %c0_11] : memref<128x128xf32, #tpu.memory_space<vmem>>, vector<128x128xf32>
      tpu.vector_store %arg7[%c0_10, %c0_11], %13 {strides = array<i32>} : memref<128x128xf32, #tpu.memory_space<vmem>>, vector<128x128xf32>,
    } else {
    }
    %c0 = arith.constant 0 : index
    %c0_1 = arith.constant 0 : index
    %3 = vector.load %arg7[%c0, %c0_1] : memref<128x128xf32, #tpu.memory_space<vmem>>, vector<128x128xf32>
    %c0_2 = arith.constant 0 : index
    %c0_3 = arith.constant 0 : index
    %4 = vector.load %arg2[%c0_2, %c0_3] : memref<128x128xi8, #tpu.memory_space<vmem>>, vector<128x128xi8>
    %5 = arith.sitofp %4 : vector<128x128xi8> to vector<128x128xbf16>
    %c0_4 = arith.constant 0 : index
    %c0_5 = arith.constant 0 : index
    %6 = vector.load %arg3[%c0_4, %c0_5] : memref<128x128xbf16, #tpu.memory_space<vmem>>, vector<128x128xbf16>
    %cst = arith.constant dense<0.000000e+00> : vector<128x128xf32>
    %7 = tpu.matmul %5, %6, %cst {dimension_numbers = #tpu.dot_dimension_numbers<[1], [0], [0], [1], [0, 0, 1, 1], [], []>} : vector<128x128xbf16>, vector<128x128xbf16>, vector<128x128xf32> -> vector<128x128xf32>
    %8 = arith.addf %3, %7 : vector<128x128xf32>
    %c0_6 = arith.constant 0 : index
    %c0_7 = arith.constant 0 : index
    %9 = vector.load %arg7[%c0_6, %c0_7] : memref<128x128xf32, #tpu.memory_space<vmem>>, vector<128x128xf32>
    tpu.vector_store %arg7[%c0_6, %c0_7], %8 {strides = array<i32>} : memref<128x128xf32, #tpu.memory_space<vmem>>, vector<128x128xf32>,
    %c1_i32 = arith.constant 1 : i32
    %10 = arith.cmpi eq, %arg1, %c1_i32 : i32
    %11 = arith.extui %10 : i1 to i32
    %c0_i32_8 = arith.constant 0 : i32
    %12 = arith.cmpi ne, %11, %c0_i32_8 : i32
    scf.if %12 {
      %c0_9 = arith.constant 0 : index
      %c0_10 = arith.constant 0 : index
      %13 = vector.load %arg7[%c0_9, %c0_10] : memref<128x128xf32, #tpu.memory_space<vmem>>, vector<128x128xf32>
      %c0_11 = arith.constant 0 : index
      %c0_12 = arith.constant 0 : index
      %14 = vector.load %arg4[%c0_11, %c0_12] : memref<128x1xf32, #tpu.memory_space<vmem>>, vector<128x1xf32>
      %15 = vector.broadcast %14 : vector<128x1xf32> to vector<128x128xf32>
      %16 = arith.mulf %13, %15 : vector<128x128xf32>
      %c0_13 = arith.constant 0 : index
      %c0_14 = arith.constant 0 : index
      %17 = vector.load %arg5[%c0_13, %c0_14] : memref<128x128xf32, #tpu.memory_space<vmem>>, vector<128x128xf32>
      %18 = arith.addf %16, %17 : vector<128x128xf32>
      %cst_15 = arith.constant 0.000000e+00 : f32
      %19 = vector.broadcast %cst_15 : f32 to vector<128x128xf32>
      %20 = arith.maximumf %18, %19 : vector<128x128xf32>
      %21 = arith.truncf %20 : vector<128x128xf32> to vector<128x128xbf16>
      %c0_16 = arith.constant 0 : index
      %c0_17 = arith.constant 0 : index
      %22 = vector.load %arg6[%c0_16, %c0_17] : memref<128x128xbf16, #tpu.memory_space<vmem>>, vector<128x128xbf16>
      tpu.vector_store %arg6[%c0_16, %c0_17], %21 {strides = array<i32>} : memref<128x128xbf16, #tpu.memory_space<vmem>>, vector<128x128xbf16>,
    } else {
    }
    return
  }
  func.func @transform_0(%arg0: i32, %arg1: i32) -> (i32, i32) {
    %c0_i32 = arith.constant 0 : i32
    return %arg0, %arg1 : i32, i32
  }
  func.func @transform_1(%arg0: i32, %arg1: i32) -> (i32, i32) {
    %c0_i32 = arith.constant 0 : i32
    %c0_i32_0 = arith.constant 0 : i32
    return %arg1, %c0_i32 : i32, i32
  }
  func.func @transform_2(%arg0: i32, %arg1: i32) -> (i32, i32) {
    %c0_i32 = arith.constant 0 : i32
    %c0_i32_0 = arith.constant 0 : i32
    return %arg0, %c0_i32 : i32, i32
  }
  func.func @transform_3(%arg0: i32, %arg1: i32) -> (i32, i32) {
    %c0_i32 = arith.constant 0 : i32
    %c0_i32_0 = arith.constant 0 : i32
    return %arg0, %c0_i32 : i32, i32
  }
  func.func @transform_4(%arg0: i32, %arg1: i32) -> (i32, i32) {
    %c0_i32 = arith.constant 0 : i32
    %c0_i32_0 = arith.constant 0 : i32
    return %arg0, %c0_i32 : i32, i32
  }
}

</mosaic_0001>

<bundles_post_ra>
// kernel: tpu_custom_call.1
= control target key start
LH: loop header
LB: loop body
LE: loop exit
PB: predicated region body
PF: predicated region fallthrough
CT: control target
= control target key end

     0   :  { %s1959_s0 = inlined_call_operand.hbm [shape: s8[256,256], index: 0, kind: input, shape index: {}]   ;;  %s1960_s1 = inlined_call_operand.hbm [shape: bf16[256,128], index: 1, kind: input, shape index: {}]   ;;  %s1961_s2 = inlined_call_operand.vmem [shape: f32[256,1], index: 2, kind: input, shape index: {}]   ;;  %s1962_s3 = inlined_call_operand.vmem [shape: f32[256,128], index: 3, kind: input, shape index: {}]   ;;  %s1963_s4 = inlined_call_operand.hbm [shape: bf16[256,128], index: 4, kind: output, shape index: {}]  }
   0x1   :  { %1974 = sst [smem:[#allocation17_spill]] %s1959_s0 }
   0x2   :  { %1975 = sst [smem:[#allocation18_spill]] %s1960_s1 }
   0x3   :  { %1976 = sst [smem:[#allocation19_spill]] %s1961_s2 }
   0x4   :  { %1977 = sst [smem:[#allocation20_spill]] %s1962_s3 }
   0x5   :  { %1978 = sst [smem:[#allocation21_spill]] %s1963_s4 }
   0x6   :  { %9 = vsyncpa [#allocation4], 0 }
   0x7   :  { %11 = vsyncpa [#allocation4 + $0x1], 0 }
   0x8   :  { %12 = vsyncpa [#allocation7], 0 }
   0x9   :  { %14 = vsyncpa [#allocation7 + $0x1], 0 }
   0xa   :  { %15 = vsyncpa [#allocation5], 0 }
   0xb   :  { %17 = vsyncpa [#allocation5 + $0x1], 0  ;;  %s1547_s15 = smov 0   ;;  %s1549_s16 = smov 0  }
   0xc   :  { %s1551_s17 = smov 0   ;;  %s1553_s18 = smov 0  }
   0xd   :  { %s1555_s19 = smov 0   ;;  %s1557_s20 = smov 0  }
   0xe   :  { %s1559_s21 = smov 0   ;;  %s1561_s22 = smov 0  }
   0xf   :  { %s1563_s23 = smov 0   ;;  %s1565_s24 = smov 0  }
  0x10   :  { %s1567_s25 = smov 0   ;;  %s1569_s26 = smov 0  }
  0x11   :  { %s1571_s27 = smov 0   ;;  %s1573_s28 = smov 0  }
  0x12 LB: > { %1979 = sst [smem:[#allocation12_spill]] %s1456_s15  ;;  %s32_s29 = sadd.s32 1, %s1500_s26  ;;  %s1508_s28 = sphi %s1573_s28, %s23_s28   ;;  %s1504_s27 = sphi %s1571_s27, %s2026_s27   ;;  %s1500_s26 = sphi %s1569_s26, %s2025_s26   ;;  %s1496_s25 = sphi %s1567_s25, %s2024_s25   ;;  %s1492_s24 = sphi %s1565_s24, %s2023_s24   ;;  %s1488_s23 = sphi %s1563_s23, %s2022_s23   ;;  %s1484_s22 = sphi %s1561_s22, %s2021_s22   ;;  %s1480_s21 = sphi %s1559_s21, %s2020_s21   ;;  %s1476_s20 = sphi %s1557_s20, %s2019_s20   ;;  %s1472_s19 = sphi %s1555_s19, %s2018_s19   ;;  %s1468_s18 = sphi %s1553_s18, %s2017_s18   ;;  %s1464_s17 = sphi %s1551_s17, %s2016_s17   ;;  %s1460_s16 = sphi %s1549_s16, %s2015_s16   ;;  %s1456_s15 = sphi %s1547_s15, %s2014_s15  }
  0x13   : > { %1980 = sst [smem:[#allocation13_spill]] %s1492_s24  ;;  %s35_s30 = sadd.s32 1, %s1504_s27 }
  0x14   : > { %1981 = sst [smem:[#allocation14_spill]] %s1496_s25  ;;  %p33_p0 = scmp.ge.s32.totalorder %s32_s29, 2 }
  0x15   : > { %s44_s5 = sadd.s32 1, %s1488_s23  ;;  %p51_p1 = scmp.ne.s32.totalorder %s1488_s23, %s1484_s22 }
  0x16   : > { %p1968_p2 = scmp.eq.s32.totalorder %s1508_s28, 0  ;;  %s2028_s29 = smov (%p33_p0, %s32_s29), 0 }
  0x17   : > { %1982 = sst [smem:[#allocation15_spill]] %s2028_s29  ;;  %s2030_s30 = smov (!%p33_p0, %s35_s30), %s1504_s27 }
  0x18   : > { %s1628_s6 = ssub.s32 %s1500_s26, %s2028_s29  ;;  %p1632_p3 = por %p1968_p2, %p51_p1 }
  0x19   : > { %p37_p4 = scmp.ge.s32.totalorder %s2030_s30, 2  ;;  %s148_s8 = sadd.s32 1, %s1464_s17 }
  0x1a   : > { %p1967_p7 = scmp.lt.s32.totalorder %s1508_s28, 4  ;;  %s185_s10 = sand.u32 1, %s1488_s23  }
  0x1b   : > { %s2032_s30 = smov (%p37_p4, %s2030_s30), 0  ;;  %s972_s14 = sshll.u32 %s185_s10, 5 }
  0x1c   : > { %1984 = sst [smem:[#allocation16_spill]] %s2032_s30  ;;  %s39_s9 = ssub.s32 %s1504_s27, %s2032_s30 }
  0x1d   : > { %s41_s11 = sor.u32 %s1628_s6, %s39_s9  ;;  %p146_p8 = scmp.eq.s32.totalorder %s39_s9, 0 }
  0x1e   : > { %p42_p9 = scmp.eq.s32.totalorder %s41_s11, 0  ;;  %s1018_s29 = sshll.u32 %s1504_s27, 3 }
  0x1f   : > { %s1648_s12 = scalar_select %p146_p8, %s1464_s17, %s148_s8  }
  0x20   : > { %s1651_s13 = scalar_select %p42_p9, %s1488_s23, %s44_s5  }
  0x21   : > { %s195_s4 = sadd.s32 %s1500_s26, %s1018_s29  ;;  %s189_s3 = scalar_lea.vmem [#allocation3], %s972_s14 }
  0x22   : > { %s975_s24 = sshll.u32 %s195_s4, 7  ;;  %s198_s2 = sshll.u32 %s189_s3, 4  ;;  %s1660_s2 = int_to_ptr.vmem [resolvable:$true] %s198_s2 }
  0x23   : > { %s1985_s0 = sld [smem:[#allocation17_spill]]  ;;  %p1666_p10 = pnand %p1967_p7, %p1632_p3 }
  0x24   : > { %p979_p11 = scmp.ge.s32.totalorder %s1508_s28, 1  ;;  %s1671_s3 = scalar_lea.sflag [#allocation4], %s185_s10 }
  0x25   : > { %p1300_p13 = pneg %p1666_p10 }
  0x29   : > { %s1658_s15 = scalar_lea.hbm %s1985_s0, %s975_s24  ;;  %s1303_s25 = scalar_lea.hbm %s1985_s0, 2048 }
  0x2a   : > { %s1298_s1 = scalar_lea.hbm %s1658_s15, 512  ;;  %p1304_p3 = scmp.lt.u32.totalorder %s1658_s15, %s1985_s0 }
  0x2b   : > { %p1299_p12 = scmp.ne.s32.totalorder %s1658_s15, %s1298_s1  ;;  %p1305_p4 = scmp.lt.u32.totalorder %s1303_s25, %s1298_s1 }
  0x2c   : > { %p1307_p9 = scmp.lt.u32.totalorder %s1298_s1, %s1658_s15 }
  0x2d   : > { %p1301_p0 = pnand %p1300_p13, %p1299_p12  ;;  %p1306_p8 = por %p1305_p4, %p1304_p3 }
  0x2f   : > { %p1302_p1 = pneg %p1301_p0  ;;  %p1308_p7 = por %p1307_p9, %p1306_p8 }
  0x31   : > { %p1309_p2 = pnand %p1308_p7, %p1302_p1 }
  0x33   : > { %1312 = shalt.err (!%p1309_p2)
}
  0x34   : > { %s1313_s8 = scalar_lea.vmem %s1660_s2, 512  ;;  %s1510_s9 = smov [#allocation3]  }
  0x35   : > { %p1314_p12 = scmp.ne.s32.totalorder %s1660_s2, %s1313_s8  ;;  %s1318_s10 = sshll.u32 %s1510_s9, 4  ;;  %s1319_s10 = int_to_ptr.vmem [resolvable:$false] %s1318_s10 }
  0x36   : > { %s1320_s11 = scalar_lea.vmem %s1319_s10, 1024  ;;  %p1321_p6 = scmp.lt.s32.totalorder %s1660_s2, %s1319_s10 }
  0x37   : > { %p1316_p0 = pnand %p1314_p12, %p1300_p13  ;;  %p1322_p3 = scmp.lt.s32.totalorder %s1320_s11, %s1313_s8 }
  0x39   : > { %p1317_p5 = pneg %p1316_p0  ;;  %p1323_p4 = por %p1322_p3, %p1321_p6 }
  0x3b   : > { %p1324_p8 = pnand %p1323_p4, %p1317_p5 }
  0x3d   : > { %1327 = shalt.err (!%p1324_p8)
}
  0x3e   : > { %s1511_s14 = smov 256   ;;  %s1512_s1 = smov 128  }
  0x3f   : > { %s1513_s4 = smov 8   ;;  %s1987_s24 = sld [smem:[#allocation12_spill]] }
  0x40   : > { %1157 = dma.hbm_to_vmem [thread:$0]  (!%p1666_p10), %s1658_s15, 512, %s1660_s2, %s1671_s3, %s1511_s14, %s1512_s1, %s1513_s4  }
  0x41   : > { %p245_p2 = scmp.lt.s32.totalorder %s1508_s28, 5  ;;  %s968_s29 = sadd.s32 4294967295, %s1508_s28  }
  0x42   : > { %s969_s7 = sadd.s32 4294967294, %s1508_s28   ;;  %p58_p6 = scmp.eq.s32.totalorder %s968_s29, 0 }
  0x43   : > { %p1702_p5 = pnand %p979_p11, %p245_p2  ;;  %s70_s8 = sadd.s32 1, %s1476_s20 }
  0x44   : > { %p1989_p7 = scmp.eq.s32.totalorder %s1628_s6, 0  ;;  %p1990_p13 = scmp.ne.s32.totalorder %s1484_s22, %s1480_s21 }
  0x45   : > { %p77_p10 = scmp.ne.s32.totalorder %s1476_s20, %s1472_s19  ;;  %p83_p11 = scmp.ne.s32.totalorder %s1472_s19, %s1468_s18 }
  0x46   : > { %s1712_s9 = scalar_select %p1989_p7, %s1476_s20, %s70_s8  }
  0x47   : > { %p1717_p1 = por %p58_p6, %p1990_p13  ;;  %p158_p9 = scmp.ne.s32.totalorder %s1464_s17, %s1460_s16 }
  0x48   : > { %p1992_p12 = scmp.eq.s32.totalorder %s1508_s28, 0  ;;  %p159_p3 = scmp.eq.s32.totalorder %s968_s29, 3 }
  0x49   : > { %s1991_s5 = scalar_select %p1717_p1, 1, 0 }
  0x4a   : > { %p79_p0 = por %p77_p10, %p1992_p12  ;;  %p1729_p4 = por %p83_p11, %p58_p6 }
  0x4b   : > { %p164_p8 = scmp.ne.s32.totalorder %s1460_s16, %s1987_s24  ;;  %p1735_p2 = por %p159_p3, %p158_p9 }
  0x4c   : > { %s1993_s2 = scalar_select %p1729_p4, 1, 0 }
  0x4d   : > { %s1994_s15 = scalar_select %p1735_p2, 1, 0 }
  0x4e   : > { %p165_p7 = scmp.eq.s32.totalorder %s969_s7, 3  ;;  %s208_s21 = sand.u32 1, %s1476_s20  }
  0x4f   : > { %s1019_s6 = sshll.u32 %s1500_s26, 10  ;;  %s976_s18 = sshll.u32 %s208_s21, 6 }
  0x50   : > { %p1741_p13 = por %p165_p7, %p164_p8  ;;  %s1996_s14 = sld [smem:[#allocation18_spill]] }
  0x51   : > { %p1997_p6 = scmp.lt.s32.totalorder %s1508_s28, 4  ;;  %s212_s24 = scalar_lea.vmem [#allocation6], %s976_s18 }
  0x52   : > { %s1995_s3 = scalar_select %p1741_p13, 1, 0 }
  0x53   : > { %p1752_p10 = pnand %p1997_p6, %p79_p0  ;;  %s219_s29 = sshll.u32 %s212_s24, 4  ;;  %s1756_s29 = int_to_ptr.vmem [resolvable:$true] %s219_s29 }
  0x54   : > { %s1758_s7 = scalar_lea.sflag [#allocation7], %s208_s21 }
  0x55   : > { %p1330_p9 = pneg %p1752_p10 }
  0x56   : > { %s1748_s1 = scalar_lea.hbm %s1996_s14, %s1019_s6  ;;  %s1333_s11 = scalar_lea.hbm %s1996_s14, 2048 }
  0x57   : > { %s1328_s8 = scalar_lea.hbm %s1748_s1, 1024  ;;  %p1334_p0 = scmp.lt.u32.totalorder %s1748_s1, %s1996_s14 }
  0x58   : > { %p1329_p11 = scmp.ne.s32.totalorder %s1748_s1, %s1328_s8  ;;  %p1335_p8 = scmp.lt.u32.totalorder %s1333_s11, %s1328_s8 }
  0x59   : > { %p1337_p6 = scmp.lt.u32.totalorder %s1328_s8, %s1748_s1 }
  0x5a   : > { %p1331_p12 = pnand %p1330_p9, %p1329_p11  ;;  %p1336_p7 = por %p1335_p8, %p1334_p0 }
  0x5c   : > { %p1332_p3 = pneg %p1331_p12  ;;  %p1338_p13 = por %p1337_p6, %p1336_p7 }
  0x5e   : > { %p1339_p2 = pnand %p1338_p13, %p1332_p3 }
  0x60   : > { %1342 = shalt.err (!%p1339_p2)
}
  0x61   : > { %s1343_s21 = scalar_lea.vmem %s1756_s29, 1024  ;;  %s1514_s18 = smov [#allocation6]  }
  0x62   : > { %p1344_p11 = scmp.ne.s32.totalorder %s1756_s29, %s1343_s21  ;;  %s1348_s24 = sshll.u32 %s1514_s18, 4  ;;  %s1349_s24 = int_to_ptr.vmem [resolvable:$false] %s1348_s24 }
  0x63   : > { %s1350_s0 = scalar_lea.vmem %s1349_s24, 2048  ;;  %p1351_p1 = scmp.lt.s32.totalorder %s1756_s29, %s1349_s24 }
  0x64   : > { %p1346_p12 = pnand %p1344_p11, %p1330_p9  ;;  %p1352_p0 = scmp.lt.s32.totalorder %s1350_s0, %s1343_s21 }
  0x66   : > { %p1347_p4 = pneg %p1346_p12  ;;  %p1353_p8 = por %p1352_p0, %p1351_p1 }
  0x68   : > { %p1354_p7 = pnand %p1353_p8, %p1347_p4 }
  0x6a   : > { %1357 = shalt.err (!%p1354_p7)
}
  0x6b   : > { %s1515_s30 = smov 64   ;;  %s1516_s8 = smov 4  }
  0x6c   : > { %1160 = dma.hbm_to_vmem [thread:$0]  (!%p1752_p10), %s1748_s1, 1024, %s1756_s29, %s1758_s7, %s1515_s30, %s1515_s30, %s1516_s8  }
  0x6d   : > { %249 = sbr.rel (%p1702_p5) target bundleno = 551 (0x227), region = 36  ;;  %s251_s6 = sand.u32 (!%p1702_p5), 1, %s1484_s22  }
  0x6e   : > { %s980_s10 = sshll.u32 (!%p1702_p5), %s251_s6, 5  ;;  %s252_s11 = scalar_lea.sflag (!%p1702_p5), [#allocation4], %s251_s6 }
  0x6f   : > { %s1789_s21 = scalar_lea.vmem (!%p1702_p5), [#allocation3], %s980_s10  ;;  %p1999_p1 = scmp.ne.s32.totalorder (!%p1702_p5), %s1991_s5, 0 }
  0x74   : > { %1443 = dma.done.wait (%p1999_p1), %s252_s11, 512  }
  0x75   : > { %1445 = vsyncadd (%p1999_p1), %s252_s11, 4294966784  ;;  %s260_s18 = sand.u32 1, %s1472_s19   ;;  %p2000_p5 = scmp.ne.s32.totalorder %s1993_s2, 0 }
  0x76   : > { %s981_s4 = sshll.u32 %s260_s18, 6  ;;  %s261_s1 = scalar_lea.sflag [#allocation7], %s260_s18 }
  0x77   : > { %s1796_s29 = scalar_lea.vmem [#allocation6], %s981_s4 }
  0x78   : > { %1447 = dma.done.wait (%p2000_p5), %s261_s1, 1024  }
  0x79   : > { %1449 = vsyncadd (%p2000_p5), %s261_s1, 4294966272  ;;  %s2001_s25 = sld [smem:[#allocation14_spill]]  ;;  %s301_s7 = sand.u32 1, %s1460_s16  }
  0x7a   : > { %s982_s5 = sshll.u32 %s301_s7, 6  ;;  %s2002_s6 = sld [smem:[#allocation19_spill]] }
  0x7b   : > { %s2003_s4 = sld [smem:[#allocation20_spill]]  ;;  %s1816_s1 = scalar_lea.vmem [#allocation8], %s982_s5 }
  0x7c   : > { %s2004_s14 = sld [smem:[#allocation13_spill]] }
  0x7f   : > { %s983_s24 = sshll.u32 %s2001_s25, 4 }
  0x80   : > { %p307_p4 = scmp.lt.s32.totalorder %s983_s24, 31 }
  0x82   : > { %s2034_s24 = smov (!%p307_p4, %s983_s24), 31  ;;  %p987_p2 = scmp.ne.s32.totalorder %s2004_s14, 0 }
  0x83   : > { %s984_s0 = sshll.u32 %s2034_s24, 3  ;;  %v1517_v0 = vmov (!%p987_p2), 0.0  }
  0x84   : > { %s1809_s10 = scalar_lea.vmem %s2002_s6, %s984_s0  ;;  %s1814_s2 = scalar_lea.vmem %s2003_s4, %s984_s0  ;;  %324 = vst [vmem:[#allocation2] sm:$0xff] (!%p987_p2), %v1517_v0  ;;  %325 = vst [vmem:[#allocation2 + $0x8] sm:$0xff] (!%p987_p2), %v1517_v0 }
  0x85   : > { %323 = sbr.rel (%p987_p2) target bundleno = 140 (0x8c), region = 48  ;;  %326 = vst [vmem:[#allocation2 + $0x10] sm:$0xff] (!%p987_p2), %v1517_v0  ;;  %327 = vst [vmem:[#allocation2 + $0x18] sm:$0xff] (!%p987_p2), %v1517_v0 }
  0x86   : > { %328 = vst [vmem:[#allocation2 + $0x20] sm:$0xff] (!%p987_p2), %v1517_v0  ;;  %329 = vst [vmem:[#allocation2 + $0x28] sm:$0xff] (!%p987_p2), %v1517_v0 }
  0x87   : > { %330 = vst [vmem:[#allocation2 + $0x30] sm:$0xff] (!%p987_p2), %v1517_v0  ;;  %331 = vst [vmem:[#allocation2 + $0x38] sm:$0xff] (!%p987_p2), %v1517_v0 }
  0x88   : > { %332 = vst [vmem:[#allocation2 + $0x40] sm:$0xff] (!%p987_p2), %v1517_v0  ;;  %333 = vst [vmem:[#allocation2 + $0x48] sm:$0xff] (!%p987_p2), %v1517_v0 }
  0x89   : > { %334 = vst [vmem:[#allocation2 + $0x50] sm:$0xff] (!%p987_p2), %v1517_v0  ;;  %335 = vst [vmem:[#allocation2 + $0x58] sm:$0xff] (!%p987_p2), %v1517_v0 }
  0x8a   : > { %336 = vst [vmem:[#allocation2 + $0x60] sm:$0xff] (!%p987_p2), %v1517_v0  ;;  %337 = vst [vmem:[#allocation2 + $0x68] sm:$0xff] (!%p987_p2), %v1517_v0 }
  0x8b   : > { %338 = vst [vmem:[#allocation2 + $0x70] sm:$0xff] (!%p987_p2), %v1517_v0  ;;  %339 = vst [vmem:[#allocation2 + $0x78] sm:$0xff] (!%p987_p2), %v1517_v0 }
  0x8c PF: > { %v1288_v1 = vld [vmem:[%s1796_s29] sm:$0xff]   ;;  %v1289_v2 = vld [vmem:[%s1796_s29 + $0x8] sm:$0xff]   ;;  %v1290_v3 = vld [vmem:[%s1796_s29 + $0x10] sm:$0xff]   ;;  %s2005_s14 = sld [smem:[#allocation13_spill]] }
  0x8d   : > { %1100 = vmatprep.subr.bf16.mxu0 %v1288_v1  ;;  %1132 = vmatprep.subr.bf16.mxu1 %v1288_v1  ;;  %v1291_v4 = vld [vmem:[%s1796_s29 + $0x18] sm:$0xff]   ;;  %v356_v5 = vld [vmem:[%s1789_s21] sm:$0xff]  ;;  %v358_v6 = vld [vmem:[%s1789_s21 + $0x10] sm:$0xff] }
  0x8e   : > { %1101 = vmatpush3.bf16.msra.mxu0 %v1288_v1  ;;  %1140 = vmatpush3.bf16.msra.mxu1 %v1288_v1  ;;  %v360_v7 = vunpack.c.l.s8.bf16 %v356_v5  ;;  %v364_v8 = vunpack.c.l.s8.bf16 %v358_v6  ;;  %v1292_v9 = vld [vmem:[%s1796_s29 + $0x20] sm:$0xff]   ;;  %v1293_v10 = vld [vmem:[%s1796_s29 + $0x28] sm:$0xff]   ;;  %v1294_v11 = vld [vmem:[%s1796_s29 + $0x30] sm:$0xff]   ;;  %v361_v15 = vunpack.c.h.s8.bf16 %v356_v5  ;;  %v365_v16 = vunpack.c.h.s8.bf16 %v358_v6 }
  0x8f   : > { %1102 = vmatprep.subr.bf16.mxu0 %v1289_v2  ;;  %1133 = vmatprep.subr.bf16.mxu1 %v1289_v2  ;;  %v1295_v12 = vld [vmem:[%s1796_s29 + $0x38] sm:$0xff]   ;;  %v357_v13 = vld [vmem:[%s1789_s21 + $0x8] sm:$0xff]  ;;  %v342_v21 = vld [vmem:[#allocation2 + $0x10] sm:$0xff] }
  0x90   : > { %1116 = vmatprep.mubr.bf16.mxu0 %v360_v7  ;;  %1124 = vmatprep.mubr.bf16.mxu1 %v364_v8  ;;  %v359_v14 = vld [vmem:[%s1789_s21 + $0x18] sm:$0xff]  ;;  %v362_v17 = vunpack.c.l.s8.bf16 %v357_v13  ;;  %v363_v19 = vunpack.c.h.s8.bf16 %v357_v13  ;;  %v350_v22 = vld [vmem:[#allocation2 + $0x50] sm:$0xff]  ;;  %v340_v23 = vld [vmem:[#allocation2] sm:$0xff] }
  0x91   : > { %v366_v18 = vunpack.c.l.s8.bf16 %v359_v14  ;;  %v367_v20 = vunpack.c.h.s8.bf16 %v359_v14  ;;  %v348_v24 = vld [vmem:[#allocation2 + $0x40] sm:$0xff]  ;;  %v343_v27 = vld [vmem:[#allocation2 + $0x18] sm:$0xff]  ;;  %v341_v33 = vld [vmem:[#allocation2 + $0x8] sm:$0xff] }
  0x92   : > { %1103 = vmatpush3.bf16.msra.mxu0 %v1289_v2  ;;  %1141 = vmatpush3.bf16.msra.mxu1 %v1289_v2  ;;  %v351_v28 = vld [vmem:[#allocation2 + $0x58] sm:$0xff]  ;;  %v349_v34 = vld [vmem:[#allocation2 + $0x48] sm:$0xff]  ;;  %v346_v45 = vld [vmem:[#allocation2 + $0x30] sm:$0xff]  ;;  %p996_p13 = scmp.ne.s32.totalorder %s2005_s14, 1 }
  0x93   : > { %1104 = vmatprep.subr.bf16.mxu0 %v1290_v3  ;;  %1134 = vmatprep.subr.bf16.mxu1 %v1290_v3  ;;  %v354_v46 = vld [vmem:[#allocation2 + $0x70] sm:$0xff]  ;;  %v344_v47 = vld [vmem:[#allocation2 + $0x20] sm:$0xff]  ;;  %v347_v51 = vld [vmem:[#allocation2 + $0x38] sm:$0xff]  ;;  %v1518_v7 = vmov (!%p996_p13), 0  }
  0x94   : > { %v352_v48 = vld [vmem:[#allocation2 + $0x60] sm:$0xff]  ;;  %v355_v52 = vld [vmem:[#allocation2 + $0x78] sm:$0xff]  ;;  %v345_v57 = vld [vmem:[#allocation2 + $0x28] sm:$0xff]  ;;  %1297 = vset.pattern.permute.xlu1 (!%p996_p13), %v1518_v7  ;;  %1296 = vset.pattern.permute.xlu0 (!%p996_p13), %v1518_v7 }
  0x95   : > { %v353_v58 = vld [vmem:[#allocation2 + $0x68] sm:$0xff]  ;;  %v583_v5 = vld [vmem:[%s1809_s10 + $0x10] sm:$0xff] (!%p996_p13)  ;;  %v581_v6 = vld [vmem:[%s1809_s10] sm:$0xff] (!%p996_p13) }
  0x96   : > { %1105 = vmatpush3.bf16.msra.mxu0 %v1290_v3  ;;  %1142 = vmatpush3.bf16.msra.mxu1 %v1290_v3  ;;  %v584_v8 = vld [vmem:[%s1809_s10 + $0x18] sm:$0xff] (!%p996_p13)  ;;  %v587_v13 = vld [vmem:[%s1809_s10 + $0x30] sm:$0xff] (!%p996_p13)  ;;  %v590_v14 = vld [vmem:[%s1809_s10 + $0x48] sm:$0xff] (!%p996_p13) }
  0x97   : > { %1106 = vmatprep.subr.bf16.mxu0 %v1291_v4  ;;  %1135 = vmatprep.subr.bf16.mxu1 %v1291_v4 }
  0x98   : > { %609 = vperm.xlu1 (!%p996_p13), %1297, %v583_v5   ;;  %599 = vperm.xlu0 (!%p996_p13), %1296, %v581_v6  }
  0x9a   : > { %1107 = vmatpush3.bf16.msra.mxu0 %v1291_v4  ;;  %1143 = vmatpush3.bf16.msra.mxu1 %v1291_v4 }
  0x9b   : > { %1108 = vmatprep.subr.bf16.mxu0 %v1292_v9  ;;  %1136 = vmatprep.subr.bf16.mxu1 %v1292_v9 }
  0x9c   : > { %614 = vperm.xlu1 (!%p996_p13), %1297, %v584_v8  }
  0x9e   : > { %1109 = vmatpush3.bf16.msra.mxu0 %v1292_v9  ;;  %1144 = vmatpush3.bf16.msra.mxu1 %v1292_v9  ;;  %v582_v9 = vld [vmem:[%s1809_s10 + $0x8] sm:$0xff] (!%p996_p13) }
  0x9f   : > { %1110 = vmatprep.subr.bf16.mxu0 %v1293_v10  ;;  %1137 = vmatprep.subr.bf16.mxu1 %v1293_v10 }
  0xa0   : > { %604 = vperm.xlu0 (!%p996_p13), %1296, %v582_v9   ;;  %v702_v9 = vld [vmem:[%s1814_s2 + $0x48] sm:$0xff] (!%p996_p13) }
  0xa2   : > { %1111 = vmatpush3.bf16.msra.mxu0 %v1293_v10  ;;  %1145 = vmatpush3.bf16.msra.mxu1 %v1293_v10  ;;  %v586_v10 = vld [vmem:[%s1809_s10 + $0x28] sm:$0xff] (!%p996_p13) }
  0xa3   : > { %1112 = vmatprep.subr.bf16.mxu0 %v1294_v11  ;;  %1138 = vmatprep.subr.bf16.mxu1 %v1294_v11 }
  0xa4   : > { %624 = vperm.xlu1 (!%p996_p13), %1297, %v586_v10  }
  0xa6   : > { %1113 = vmatpush3.bf16.msra.mxu0 %v1294_v11  ;;  %1146 = vmatpush3.bf16.msra.mxu1 %v1294_v11  ;;  %v585_v11 = vld [vmem:[%s1809_s10 + $0x20] sm:$0xff] (!%p996_p13) }
  0xa7   : > { %1114 = vmatprep.subr.bf16.mxu0 %v1295_v12  ;;  %1139 = vmatprep.subr.bf16.mxu1 %v1295_v12 }
  0xa8   : > { %619 = vperm.xlu0 (!%p996_p13), %1296, %v585_v11   ;;  %v701_v11 = vld [vmem:[%s1814_s2 + $0x40] sm:$0xff] (!%p996_p13) }
  0xaa   : > { %1115 = vmatpush3.bf16.msra.mxu0 %v1295_v12  ;;  %1147 = vmatpush3.bf16.msra.mxu1 %v1295_v12  ;;  %v588_v12 = vld [vmem:[%s1809_s10 + $0x38] sm:$0xff] (!%p996_p13) }
  0xab   : > { %634 = vperm.xlu1 (!%p996_p13), %1297, %v588_v12  }
  0xac   : > { %629 = vperm.xlu0 (!%p996_p13), %1296, %v587_v13  }
  0xad   : > { %1117 = vmatmul.mubr.bf16.vlgmr.msra.gmra.mrb[0].mxu0 %v361_v15  ;;  %1125 = vmatmul.mubr.bf16.vlgmr.msra.gmra.mrb[0].mxu1 %v365_v16  ;;  %v589_v15 = vld [vmem:[%s1809_s10 + $0x40] sm:$0xff] (!%p996_p13)  ;;  %v592_v16 = vld [vmem:[%s1809_s10 + $0x58] sm:$0xff] (!%p996_p13) }
  0xae   : > { %1120 = vmatprep.mubr.bf16.mxu0 %v362_v17  ;;  %1128 = vmatprep.mubr.bf16.mxu1 %v366_v18  ;;  %v591_v17 = vld [vmem:[%s1809_s10 + $0x50] sm:$0xff] (!%p996_p13)  ;;  %v594_v18 = vld [vmem:[%s1809_s10 + $0x68] sm:$0xff] (!%p996_p13) }
  0xaf   : > { %644 = vperm.xlu1 (!%p996_p13), %1297, %v590_v14  }
  0xb0   : > { %639 = vperm.xlu0 (!%p996_p13), %1296, %v589_v15  }
  0xb3   : > { %654 = vperm.xlu1 (!%p996_p13), %1297, %v592_v16  }
  0xb4   : > { %649 = vperm.xlu0 (!%p996_p13), %1296, %v591_v17  }
  0xb5   : > { %1121 = vmatmul.mubr.bf16.gmra.mrb[4].mxu0 %v363_v19  ;;  %1129 = vmatmul.mubr.bf16.gmra.mrb[4].mxu1 %v367_v20  ;;  %v593_v19 = vld [vmem:[%s1809_s10 + $0x60] sm:$0xff] (!%p996_p13)  ;;  %v596_v20 = vld [vmem:[%s1809_s10 + $0x78] sm:$0xff] (!%p996_p13) }
  0xb7   : > { %664 = vperm.xlu1 (!%p996_p13), %1297, %v594_v18  }
  0xb8   : > { %659 = vperm.xlu0 (!%p996_p13), %1296, %v593_v19  }
  0xbb   : > { %674 = vperm.xlu1 (!%p996_p13), %1297, %v596_v20  }
 0x180   : > { %v1118_v25 = vpop.f32.mrb[0].mxu0  ;;  %v1126_v26 = vpop.f32.mrb[0].mxu1 }
 0x181   : > { %v531_v29 = vadd.f32 %v1118_v25, %v342_v21  ;;  %v539_v30 = vadd.f32 %v1126_v26, %v350_v22  ;;  %v466_v31 = vpop.f32.mrb[1].mxu0  ;;  %v498_v32 = vpop.f32.mrb[1].mxu1  ;;  %v595_v21 = vld [vmem:[%s1809_s10 + $0x70] sm:$0xff] (!%p996_p13) }
 0x182   : > { %v529_v35 = vadd.f32 %v466_v31, %v340_v23  ;;  %v537_v36 = vadd.f32 %v498_v32, %v348_v24  ;;  %v1119_v37 = vpop.f32.mrb[2].mxu0  ;;  %v1127_v38 = vpop.f32.mrb[2].mxu1  ;;  %669 = vperm.xlu0 (!%p996_p13), %1296, %v595_v21   ;;  %v695_v26 = vld [vmem:[%s1814_s2 + $0x10] sm:$0xff] (!%p996_p13) }
 0x183   : > { %547 = vst [vmem:[#allocation2 + $0x10] sm:$0xff] %v531_v29  ;;  %555 = vst [vmem:[#allocation2 + $0x50] sm:$0xff] %v539_v30  ;;  %v532_v39 = vadd.f32 %v1119_v37, %v343_v27  ;;  %v540_v40 = vadd.f32 %v1127_v38, %v351_v28  ;;  %v469_v41 = vpop.f32.mrb[3].mxu0  ;;  %v501_v42 = vpop.f32.mrb[3].mxu1  ;;  %v693_v28 = vld [vmem:[%s1814_s2] sm:$0xff] (!%p996_p13) }
 0x184   : > { %545 = vst [vmem:[#allocation2] sm:$0xff] %v529_v35  ;;  %553 = vst [vmem:[#allocation2 + $0x40] sm:$0xff] %v537_v36  ;;  %v530_v43 = vadd.f32 %v469_v41, %v341_v33  ;;  %v538_v44 = vadd.f32 %v501_v42, %v349_v34  ;;  %v610_v24 = vpop.permute.xlu1 (!%p996_p13), %609  ;;  %v600_v25 = vpop.permute.xlu0 (!%p996_p13), %599  ;;  %v696_v34 = vld [vmem:[%s1814_s2 + $0x18] sm:$0xff] (!%p996_p13)  ;;  %v694_v36 = vld [vmem:[%s1814_s2 + $0x8] sm:$0xff] (!%p996_p13) }
 0x185   : > { %548 = vst [vmem:[#allocation2 + $0x18] sm:$0xff] %v532_v39  ;;  %556 = vst [vmem:[#allocation2 + $0x58] sm:$0xff] %v540_v40 }
 0x186   : > { %546 = vst [vmem:[#allocation2 + $0x8] sm:$0xff] %v530_v43  ;;  %554 = vst [vmem:[#allocation2 + $0x48] sm:$0xff] %v538_v44 }
 0x188   : > { %v1122_v49 = vpop.f32.mrb[4].mxu0  ;;  %v1130_v50 = vpop.f32.mrb[4].mxu1  ;;  %564 = sbr.rel (%p996_p13) target bundleno = 523 (0x20b), region = 52 }
 0x189   : > { %v535_v53 = vadd.f32 %v1122_v49, %v346_v45  ;;  %v543_v54 = vadd.f32 %v1130_v50, %v354_v46  ;;  %v482_v55 = vpop.f32.mrb[5].mxu0  ;;  %v514_v56 = vpop.f32.mrb[5].mxu1  ;;  %v698_v46 = vld [vmem:[%s1814_s2 + $0x28] sm:$0xff] (!%p996_p13) }
 0x18a   : > { %v533_v59 = vadd.f32 %v482_v55, %v344_v47  ;;  %v541_v60 = vadd.f32 %v514_v56, %v352_v48  ;;  %v1123_v61 = vpop.f32.mrb[6].mxu0  ;;  %v1131_v62 = vpop.f32.mrb[6].mxu1  ;;  %v567_v22 = vld [vmem:[#allocation2 + $0x10] sm:$0xff] (!%p996_p13)  ;;  %v697_v48 = vld [vmem:[%s1814_s2 + $0x20] sm:$0xff] (!%p996_p13) }
 0x18b   : > { %551 = vst [vmem:[#allocation2 + $0x30] sm:$0xff] %v535_v53  ;;  %559 = vst [vmem:[#allocation2 + $0x70] sm:$0xff] %v543_v54  ;;  %v536_v63 = vadd.f32 %v1123_v61, %v347_v51  ;;  %v544_v0 = vadd.f32 %v1131_v62, %v355_v52  ;;  %v485_v1 = vpop.f32.mrb[7].mxu0  ;;  %v517_v2 = vpop.f32.mrb[7].mxu1  ;;  %v565_v23 = vld [vmem:[#allocation2] sm:$0xff] (!%p996_p13)  ;;  %v679_v27 = vmul.f32 (!%p996_p13), %v610_v24, %v567_v22  ;;  %v699_v62 = vld [vmem:[%s1814_s2 + $0x30] sm:$0xff] (!%p996_p13) }
 0x18c   : > { %549 = vst [vmem:[#allocation2 + $0x20] sm:$0xff] %v533_v59  ;;  %557 = vst [vmem:[#allocation2 + $0x60] sm:$0xff] %v541_v60  ;;  %v534_v3 = vadd.f32 %v485_v1, %v345_v57  ;;  %v542_v4 = vadd.f32 %v517_v2, %v353_v58  ;;  %v677_v29 = vmul.f32 (!%p996_p13), %v600_v25, %v565_v23  ;;  %v568_v30 = vld [vmem:[#allocation2 + $0x18] sm:$0xff] (!%p996_p13)  ;;  %v615_v35 = vpop.permute.xlu1 (!%p996_p13), %614  ;;  %v605_v37 = vpop.permute.xlu0 (!%p996_p13), %604  ;;  %v573_v5 = vld [vmem:[#allocation2 + $0x40] sm:$0xff] (!%p996_p13) }
 0x18d   : > { %552 = vst [vmem:[#allocation2 + $0x38] sm:$0xff] %v536_v63  ;;  %560 = vst [vmem:[#allocation2 + $0x78] sm:$0xff] %v544_v0  ;;  %v566_v31 = vld [vmem:[#allocation2 + $0x8] sm:$0xff] (!%p996_p13)  ;;  %v711_v32 = vadd.f32 (!%p996_p13), %v695_v26, %v679_v27  ;;  %v680_v38 = vmul.f32 (!%p996_p13), %v615_v35, %v568_v30  ;;  %v700_v60 = vld [vmem:[%s1814_s2 + $0x38] sm:$0xff] (!%p996_p13) }
 0x18e   : > { %550 = vst [vmem:[#allocation2 + $0x28] sm:$0xff] %v534_v3  ;;  %558 = vst [vmem:[#allocation2 + $0x68] sm:$0xff] %v542_v4  ;;  %v709_v33 = vadd.f32 (!%p996_p13), %v693_v28, %v677_v29  ;;  %v678_v39 = vmul.f32 (!%p996_p13), %v605_v37, %v566_v31  ;;  %v574_v4 = vld [vmem:[#allocation2 + $0x48] sm:$0xff] (!%p996_p13)  ;;  %v576_v17 = vld [vmem:[#allocation2 + $0x58] sm:$0xff] (!%p996_p13) }
 0x18f   : > { %v712_v42 = vadd.f32 %v696_v34, %v680_v38  ;;  %v727_v44 = vmax.f32 %v711_v32, 0.0  ;;  %v575_v18 = vld [vmem:[#allocation2 + $0x50] sm:$0xff]  ;;  %v704_v22 = vld [vmem:[%s1814_s2 + $0x58] sm:$0xff]  ;;  %v706_v35 = vld [vmem:[%s1814_s2 + $0x68] sm:$0xff] }
 0x190   : > { %v710_v43 = vadd.f32 %v694_v36, %v678_v39  ;;  %v725_v45 = vmax.f32 %v709_v33, 0.0  ;;  %v625_v47 = vpop.permute.xlu1 %624  ;;  %v620_v49 = vpop.permute.xlu0 %619  ;;  %v703_v24 = vld [vmem:[%s1814_s2 + $0x50] sm:$0xff]  ;;  %v705_v37 = vld [vmem:[%s1814_s2 + $0x60] sm:$0xff] }
 0x191   : > { %v728_v50 = vmax.f32 %v712_v42, 0.0 }
 0x192   : > { %v726_v51 = vmax.f32 %v710_v43, 0.0  ;;  %v571_v55 = vld [vmem:[#allocation2 + $0x30] sm:$0xff] }
 0x193   : > { %v569_v41 = vld [vmem:[#allocation2 + $0x20] sm:$0xff]  ;;  %v1045_v56 = vpack.c.bf16 %v728_v50, %v727_v44  ;;  %v579_v44 = vld [vmem:[#allocation2 + $0x70] sm:$0xff] }
 0x194   : > { %v681_v53 = vmul.f32 %v620_v49, %v569_v41  ;;  %v572_v54 = vld [vmem:[#allocation2 + $0x38] sm:$0xff]  ;;  %v1040_v57 = vpack.c.bf16 %v726_v51, %v725_v45  ;;  %v635_v61 = vpop.permute.xlu1 %634  ;;  %v630_v63 = vpop.permute.xlu0 %629  ;;  %v577_v31 = vld [vmem:[#allocation2 + $0x60] sm:$0xff]  ;;  %v707_v50 = vld [vmem:[%s1814_s2 + $0x70] sm:$0xff] }
 0x195   : > { %v570_v40 = vld [vmem:[#allocation2 + $0x28] sm:$0xff]  ;;  %1077 = vst [vmem:[%s1816_s1 + $0x8] sm:$0xff] %v1045_v56   ;;  %v684_v2 = vmul.f32 %v635_v61, %v572_v54  ;;  %v683_v3 = vmul.f32 %v630_v63, %v571_v55  ;;  %v580_v43 = vld [vmem:[#allocation2 + $0x78] sm:$0xff] }
 0x196   : > { %v682_v52 = vmul.f32 %v625_v47, %v570_v40  ;;  %v713_v59 = vadd.f32 %v697_v48, %v681_v53  ;;  %1041 = vst [vmem:[%s1816_s1] sm:$0xff] %v1040_v57   ;;  %v578_v30 = vld [vmem:[#allocation2 + $0x68] sm:$0xff]  ;;  %v708_v48 = vld [vmem:[%s1814_s2 + $0x78] sm:$0xff] }
 0x197   : > { %v716_v7 = vadd.f32 %v700_v60, %v684_v2  ;;  %v715_v8 = vadd.f32 %v699_v62, %v683_v3 }
 0x198   : > { %v714_v58 = vadd.f32 %v698_v46, %v682_v52  ;;  %v729_v1 = vmax.f32 %v713_v59, 0.0  ;;  %v645_v10 = vpop.permute.xlu1 %644  ;;  %v640_v12 = vpop.permute.xlu0 %639 }
 0x199   : > { %v732_v13 = vmax.f32 %v716_v7, 0.0  ;;  %v731_v14 = vmax.f32 %v715_v8, 0.0  ;;  %v686_v15 = vmul.f32 %v645_v10, %v574_v4  ;;  %v685_v16 = vmul.f32 %v640_v12, %v573_v5 }
 0x19a   : > { %v730_v0 = vmax.f32 %v714_v58, 0.0 }
 0x19b   : > { %v1055_v19 = vpack.c.bf16 %v732_v13, %v731_v14  ;;  %v718_v20 = vadd.f32 %v702_v9, %v686_v15  ;;  %v717_v21 = vadd.f32 %v701_v11, %v685_v16 }
 0x19c   : > { %v1050_v6 = vpack.c.bf16 %v730_v0, %v729_v1  ;;  %v655_v23 = vpop.permute.xlu1 %654  ;;  %v650_v25 = vpop.permute.xlu0 %649 }
 0x19d   : > { %1079 = vst [vmem:[%s1816_s1 + $0x18] sm:$0xff] %v1055_v19   ;;  %v734_v26 = vmax.f32 %v718_v20, 0.0  ;;  %v733_v27 = vmax.f32 %v717_v21, 0.0  ;;  %v688_v28 = vmul.f32 %v655_v23, %v576_v17  ;;  %v687_v29 = vmul.f32 %v650_v25, %v575_v18 }
 0x19e   : > { %1078 = vst [vmem:[%s1816_s1 + $0x10] sm:$0xff] %v1050_v6  }
 0x19f   : > { %v1060_v32 = vpack.c.bf16 %v734_v26, %v733_v27  ;;  %v720_v33 = vadd.f32 %v704_v22, %v688_v28  ;;  %v719_v34 = vadd.f32 %v703_v24, %v687_v29 }
 0x1a0   : > { %v665_v36 = vpop.permute.xlu1 %664  ;;  %v660_v38 = vpop.permute.xlu0 %659 }
 0x1a1   : > { %1080 = vst [vmem:[%s1816_s1 + $0x20] sm:$0xff] %v1060_v32   ;;  %v736_v39 = vmax.f32 %v720_v33, 0.0  ;;  %v735_v40 = vmax.f32 %v719_v34, 0.0  ;;  %v690_v41 = vmul.f32 %v665_v36, %v578_v30  ;;  %v689_v42 = vmul.f32 %v660_v38, %v577_v31 }
 0x1a3   : > { %v1065_v45 = vpack.c.bf16 %v736_v39, %v735_v40  ;;  %v722_v46 = vadd.f32 %v706_v35, %v690_v41  ;;  %v721_v47 = vadd.f32 %v705_v37, %v689_v42 }
 0x1a4   : > { %v675_v49 = vpop.permute.xlu1 %674 }
 0x1a5   : > { %1081 = vst [vmem:[%s1816_s1 + $0x28] sm:$0xff] %v1065_v45   ;;  %v738_v52 = vmax.f32 %v722_v46, 0.0  ;;  %v737_v53 = vmax.f32 %v721_v47, 0.0  ;;  %v692_v54 = vmul.f32 %v675_v49, %v580_v43 }
 0x1a7   : > { %v1070_v56 = vpack.c.bf16 %v738_v52, %v737_v53  ;;  %v724_v57 = vadd.f32 %v708_v48, %v692_v54 }
 0x1a9   : > { %1082 = vst [vmem:[%s1816_s1 + $0x30] sm:$0xff] %v1070_v56   ;;  %v740_v59 = vmax.f32 %v724_v57, 0.0 }
 0x201   : > { %v670_v51 = vpop.permute.xlu0 %669 }
 0x202   : > { %v691_v55 = vmul.f32 %v670_v51, %v579_v44 }
 0x204   : > { %v723_v58 = vadd.f32 %v707_v50, %v691_v55 }
 0x206   : > { %v739_v60 = vmax.f32 %v723_v58, 0.0 }
 0x208   : > { %v1075_v61 = vpack.c.bf16 %v740_v59, %v739_v60 }
 0x20a   : > { %1083 = vst [vmem:[%s1816_s1 + $0x38] sm:$0xff] %v1075_v61  }
 0x20b PF: > { %s2006_s21 = sld [smem:[#allocation14_spill]]  ;;  %s2007_s5 = sld [smem:[#allocation21_spill]] }
 0x20c   : > { %s835_s30 = sshll.u32 %s1816_s1, 4  ;;  %s1883_s8 = scalar_lea.sflag [#allocation5], %s301_s7  ;;  %s1879_s30 = int_to_ptr.vmem [resolvable:$true] %s835_s30 }
 0x20d   : > { %s1358_s6 = scalar_lea.vmem %s1879_s30, 1024  ;;  %p2008_p9 = scmp.ne.s32.totalorder %s1994_s15, 0 }
 0x20e   : > { %p1359_p10 = scmp.ne.s32.totalorder %s1879_s30, %s1358_s6  ;;  %s1519_s10 = smov [#allocation8]  }
 0x20f   : > { %s1362_s11 = sshll.u32 %s1519_s10, 4  ;;  %s1363_s11 = int_to_ptr.vmem [resolvable:$false] %s1362_s11 }
 0x210   : > { %p1360_p3 = pnand %p1359_p10, %p2008_p9  ;;  %s1364_s18 = scalar_lea.vmem %s1363_s11, 2048 }
 0x211   : > { %s1036_s29 = sshll.u32 %s2006_s21, 10  ;;  %p1365_p11 = scmp.lt.s32.totalorder %s1879_s30, %s1363_s11 }
 0x212   : > { %s1876_s0 = scalar_lea.hbm %s2007_s5, %s1036_s29  ;;  %p1361_p6 = pneg %p1360_p3 }
 0x213   : > { %p1366_p12 = scmp.lt.s32.totalorder %s1364_s18, %s1358_s6 }
 0x215   : > { %p1367_p0 = por %p1366_p12, %p1365_p11 }
 0x217   : > { %p1368_p8 = pnand %p1367_p0, %p1361_p6 }
 0x219   : > { %1371 = shalt.err (!%p1368_p8)
}
 0x21a   : > { %s1372_s7 = scalar_lea.hbm %s1876_s0, 1024  ;;  %s1376_s1 = scalar_lea.hbm %s2007_s5, 2048 }
 0x21b   : > { %p1373_p7 = scmp.ne.s32.totalorder %s1876_s0, %s1372_s7  ;;  %p1377_p4 = scmp.lt.u32.totalorder %s1876_s0, %s2007_s5 }
 0x21c   : > { %p1378_p2 = scmp.lt.u32.totalorder %s1376_s1, %s1372_s7  ;;  %p1380_p10 = scmp.lt.u32.totalorder %s1372_s7, %s1876_s0 }
 0x21d   : > { %p1374_p1 = pnand %p1373_p7, %p2008_p9 }
 0x21e   : > { %p1379_p13 = por %p1378_p2, %p1377_p4 }
 0x21f   : > { %p1375_p5 = pneg %p1374_p1 }
 0x220   : > { %p1381_p3 = por %p1380_p10, %p1379_p13 }
 0x222   : > { %p1382_p6 = pnand %p1381_p3, %p1375_p5 }
 0x224   : > { %1385 = shalt.err (!%p1382_p6)
}
 0x225   : > { %s1520_s29 = smov 64   ;;  %s1521_s25 = smov 4  }
 0x226   : > { %1152 = dma.vmem_to_hbm [thread:$0]  (%p2008_p9), %s1879_s30, 1024, %s1876_s0, %s1883_s8, %s1520_s29, %s1520_s29, %s1521_s25  }
 0x227 PF: > { %s2009_s24 = sld [smem:[#allocation12_spill]]  ;;  %p1166_p11 = scmp.ge.s32.totalorder %s1508_s28, 2 }
 0x228   : > { %p2010_p12 = scmp.ne.s32.totalorder %s1995_s3, 0 }
 0x22a   : > { %p1162_p0 = pnand %p1166_p11, %p2010_p12 }
 0x22d   : > { %s850_s6 = sand.u32 1, %s2009_s24  }
 0x22e   : > { %s851_s10 = scalar_lea.sflag [#allocation5], %s850_s6 }
 0x22f   : > { %1451 = dma.done.wait (!%p1162_p0), %s851_s10, 1024  }
 0x230   : > { %1453 = vsyncadd (!%p1162_p0), %s851_s10, 4294966272  ;;  %s23_s28 = sadd.s32 1, %s1508_s28   ;;  %s2012_s3 = sld [smem:[#allocation15_spill]] }
 0x231   : > { %p1912_p8 = scmp.ge.s32.totalorder %s23_s28, 6   ;;  %s2013_s0 = sld [smem:[#allocation16_spill]] }
 0x232   : > { %s2014_s15 = smov %s1460_s16  ;;  %s2015_s16 = smov %s1464_s17 }
 0x233   : > { %s2016_s17 = smov %s1648_s12  ;;  %s2017_s18 = smov %s1472_s19 }
 0x234   : > { %s2018_s19 = smov %s1476_s20  ;;  %s2019_s20 = smov %s1712_s9 }
 0x235   : > { %s2020_s21 = smov %s1484_s22  ;;  %s2021_s22 = smov %s1488_s23 }
 0x236   : > { %s2022_s23 = smov %s1651_s13  ;;  %s2023_s24 = smov %s1500_s26 }
 0x237   : > { %s2024_s25 = smov %s1504_s27  ;;  %s2025_s26 = smov %s2012_s3 }
 0x238   : > { %s2026_s27 = smov %s2013_s0  ;;  %22 = sbr.rel (!%p1912_p8) target bundleno = 18 (0x12), region = 108 }
 0x23f   :  { %856 = vsyncpa [#allocation4], 1 }
 0x240   :  { %858 = vsyncpa [#allocation4 + $0x1], 1 }
 0x241   :  { %859 = vsyncpa [#allocation7], 1 }
 0x242   :  { %861 = vsyncpa [#allocation7 + $0x1], 1 }
 0x243   :  { %862 = vsyncpa [#allocation5], 1 }
 0x244   :  { %864 = vsyncpa [#allocation5 + $0x1], 1 }

</bundles_post_ra>
